<compile_context>
chip_gen: v6e
topology: v6e:2x2x1
jax: 0.10.0
libtpu: 0.0.40
codegen_flags: <defaults>
</compile_context>

<pallas_src>
import functools

import jax
import jax.numpy as jnp
from jax.experimental import pallas as pl
from jax.experimental.pallas import tpu as pltpu

EPS = 1e-6  # F.pairwise_distance default eps (added to the difference)


def network_loss_kernel(x_ref, o_ref, *, n_valid, tile_n):
    # x_ref : (L, TILE_N, D) tile in VMEM (native input dtype)
    # o_ref : (1, D) lane-dense f32 partial sum for this tile
    L, _, D = x_ref.shape

    # Hoist: load each slab exactly once per tile, cast to f32 for the math.
    xs = [x_ref[k].astype(jnp.float32) for k in range(L)]

    # Elementwise accumulation of squared differences over all pairs (VPU only);
    # the single cross-lane/sublane reduction happens once at the end.
    acc = jnp.zeros((tile_n, D), jnp.float32)
    for i in range(L - 1):
        for j in range(i + 1, L):
            d = xs[i] - xs[j] + EPS
            acc = acc + d * d

    # Mask rows that are padding (global row index >= n_valid).
    row = pl.program_id(0) * tile_n + jax.lax.broadcasted_iota(
        jnp.int32, (tile_n, D), 0
    )
    acc = jnp.where(row < n_valid, acc, 0.0)

    # One sublane reduction per tile -> lane-dense (1, D) partial.
    o_ref[...] = jnp.sum(acc, axis=0, keepdims=True)


def _pick_tile_n(L, N, D, itemsize):
    """Pick a sublane-aligned row tile sized for a modest VMEM budget."""
    sub = 16 if itemsize < 4 else 8            # packed dtypes need 16-row multiples
    budget = 4 * 1024 * 1024                   # ~4 MiB f32 working set per tile
    t = budget // max(1, L * D * 4)
    t = max(sub, min(512, (t // sub) * sub))
    n_pad = -(-N // sub) * sub                 # N rounded up to sublane multiple
    return min(t, n_pad)


def network_loss(shared_list):
    """shared_list: list of (N, D) arrays (any float dtype). Returns scalar f32 loss."""
    L = len(shared_list)
    if L < 2:
        return jnp.float32(0.0)

    # Stack in the inputs' native dtype — no f32 upcast before the DMA.
    x = jnp.stack(shared_list, axis=0)                      # (L, N, D)
    _, N, D = x.shape

    tile_n = _pick_tile_n(L, N, D, x.dtype.itemsize)
    n_tiles = -(-N // tile_n)
    n_padded = n_tiles * tile_n
    if n_padded != N:
        x = jnp.pad(x, ((0, 0), (0, n_padded - N), (0, 0)))

    kernel = functools.partial(network_loss_kernel, n_valid=N, tile_n=tile_n)

    partials = pl.pallas_call(
        kernel,
        out_shape=jax.ShapeDtypeStruct((n_tiles, D), jnp.float32),
        grid=(n_tiles,),
        in_specs=[pl.BlockSpec((L, tile_n, D), lambda n: (0, n, 0))],
        out_specs=pl.BlockSpec((1, D), lambda n: (n, 0)),
        compiler_params=pltpu.CompilerParams(
            dimension_semantics=("parallel",),
            vmem_limit_bytes=32 * 1024 * 1024,
        ),
    )(x)

    # sum_{i<j} mean_n ||x_i - x_j + eps||^2  ==  (1/N) * sum(partials).
    # The per-pair relu is a no-op on a sum of squares; keep one final clamp to
    # preserve the module's semantics exactly.
    loss = jnp.sum(partials) * (1.0 / N)
    return jnp.maximum(loss, 0.0)


def network_loss_ref(shared_list):
    """Pure-JAX reference mirroring the PyTorch module."""
    loss = jnp.float32(0.0)
    L = len(shared_list)
    for i in range(L - 1):
        for j in range(i + 1, L):
            a = shared_list[i].astype(jnp.float32)
            b = shared_list[j].astype(jnp.float32)
            diff = a - b + EPS
            d = jnp.sqrt(jnp.sum(diff * diff, axis=-1))
            loss = loss + jax.nn.relu(jnp.mean(d ** 2))
    return loss


if __name__ == "__main__":
    # Case 1: small f32 inputs, shapes consistent with the module's usage.
    key = jax.random.PRNGKey(0)
    L, N, D = 4, 8, 128
    keys = jax.random.split(key, L)
    shared_list = [jax.random.normal(k, (N, D), dtype=jnp.float32) for k in keys]

    loss = jax.block_until_ready(network_loss(shared_list))
    ref = network_loss_ref(shared_list)
    assert jnp.allclose(loss, ref, rtol=1e-5, atol=1e-4), (loss, ref)

    # Case 2: bf16 inputs, N not a multiple of the tile — exercises the grid,
    # the parallel tile axis, native-dtype DMA, and row masking.
    L2, N2, D2 = 3, 1200, 256
    keys2 = jax.random.split(jax.random.PRNGKey(1), L2)
    shared2 = [
        jax.random.normal(k, (N2, D2), dtype=jnp.float32).astype(jnp.bfloat16)
        for k in keys2
    ]
    loss2 = jax.block_until_ready(network_loss(shared2))
    ref2 = network_loss_ref(shared2)
    assert jnp.allclose(loss2, ref2, rtol=5e-4, atol=5e-4), (loss2, ref2)

    print("KERNEL_OK")
</pallas_src>

<mosaic_0001>
module attributes {stable_mosaic.version = 11 : i64} {
  func.func @network_loss_kernel(%arg0: i32, %arg1: memref<4x8x128xf32, #tpu.memory_space<vmem>>, %arg2: memref<1x128xf32, #tpu.memory_space<vmem>>) attributes {dimension_semantics = [#tpu.dimension_semantics<parallel>], iteration_bounds = array<i64: 1>, scalar_prefetch = 0 : i64, scratch_operands = 0 : i64, tpu.core_type = #tpu.core_type<tc>, window_params = [{transform_indices = @transform_0, window_bounds = array<i64: 4, 8, 128>}, {transform_indices = @transform_1, window_bounds = array<i64: 1, 128>}]} {
    %c0 = arith.constant 0 : index
    %c0_0 = arith.constant 0 : index
    %c0_1 = arith.constant 0 : index
    %0 = vector.load %arg1[%c0, %c0_0, %c0_1] : memref<4x8x128xf32, #tpu.memory_space<vmem>>, vector<1x8x128xf32>
    %1 = vector.shape_cast %0 : vector<1x8x128xf32> to vector<8x128xf32>
    %c1 = arith.constant 1 : index
    %c0_2 = arith.constant 0 : index
    %c0_3 = arith.constant 0 : index
    %2 = vector.load %arg1[%c1, %c0_2, %c0_3] : memref<4x8x128xf32, #tpu.memory_space<vmem>>, vector<1x8x128xf32>
    %3 = vector.shape_cast %2 : vector<1x8x128xf32> to vector<8x128xf32>
    %c2 = arith.constant 2 : index
    %c0_4 = arith.constant 0 : index
    %c0_5 = arith.constant 0 : index
    %4 = vector.load %arg1[%c2, %c0_4, %c0_5] : memref<4x8x128xf32, #tpu.memory_space<vmem>>, vector<1x8x128xf32>
    %5 = vector.shape_cast %4 : vector<1x8x128xf32> to vector<8x128xf32>
    %c3 = arith.constant 3 : index
    %c0_6 = arith.constant 0 : index
    %c0_7 = arith.constant 0 : index
    %6 = vector.load %arg1[%c3, %c0_6, %c0_7] : memref<4x8x128xf32, #tpu.memory_space<vmem>>, vector<1x8x128xf32>
    %7 = vector.shape_cast %6 : vector<1x8x128xf32> to vector<8x128xf32>
    %cst = arith.constant 0.000000e+00 : f32
    %8 = vector.broadcast %cst : f32 to vector<8x128xf32>
    %9 = arith.subf %1, %3 : vector<8x128xf32>
    %cst_8 = arith.constant 9.99999997E-7 : f32
    %10 = vector.broadcast %cst_8 : f32 to vector<8x128xf32>
    %11 = arith.addf %9, %10 : vector<8x128xf32>
    %12 = arith.mulf %11, %11 : vector<8x128xf32>
    %13 = arith.addf %8, %12 : vector<8x128xf32>
    %14 = arith.subf %1, %5 : vector<8x128xf32>
    %cst_9 = arith.constant 9.99999997E-7 : f32
    %15 = vector.broadcast %cst_9 : f32 to vector<8x128xf32>
    %16 = arith.addf %14, %15 : vector<8x128xf32>
    %17 = arith.mulf %16, %16 : vector<8x128xf32>
    %18 = arith.addf %13, %17 : vector<8x128xf32>
    %19 = arith.subf %1, %7 : vector<8x128xf32>
    %cst_10 = arith.constant 9.99999997E-7 : f32
    %20 = vector.broadcast %cst_10 : f32 to vector<8x128xf32>
    %21 = arith.addf %19, %20 : vector<8x128xf32>
    %22 = arith.mulf %21, %21 : vector<8x128xf32>
    %23 = arith.addf %18, %22 : vector<8x128xf32>
    %24 = arith.subf %3, %5 : vector<8x128xf32>
    %cst_11 = arith.constant 9.99999997E-7 : f32
    %25 = vector.broadcast %cst_11 : f32 to vector<8x128xf32>
    %26 = arith.addf %24, %25 : vector<8x128xf32>
    %27 = arith.mulf %26, %26 : vector<8x128xf32>
    %28 = arith.addf %23, %27 : vector<8x128xf32>
    %29 = arith.subf %3, %7 : vector<8x128xf32>
    %cst_12 = arith.constant 9.99999997E-7 : f32
    %30 = vector.broadcast %cst_12 : f32 to vector<8x128xf32>
    %31 = arith.addf %29, %30 : vector<8x128xf32>
    %32 = arith.mulf %31, %31 : vector<8x128xf32>
    %33 = arith.addf %28, %32 : vector<8x128xf32>
    %34 = arith.subf %5, %7 : vector<8x128xf32>
    %cst_13 = arith.constant 9.99999997E-7 : f32
    %35 = vector.broadcast %cst_13 : f32 to vector<8x128xf32>
    %36 = arith.addf %34, %35 : vector<8x128xf32>
    %37 = arith.mulf %36, %36 : vector<8x128xf32>
    %38 = arith.addf %33, %37 : vector<8x128xf32>
    %c8_i32 = arith.constant 8 : i32
    %39 = arith.muli %arg0, %c8_i32 : i32
    %40 = tpu.iota {dimensions = array<i32: 0>} : vector<8x128xi32>
    %41 = vector.broadcast %39 : i32 to vector<8x128xi32>
    %42 = arith.addi %41, %40 : vector<8x128xi32>
    %c8_i32_14 = arith.constant 8 : i32
    %43 = vector.broadcast %c8_i32_14 : i32 to vector<8x128xi32>
    %44 = arith.cmpi slt, %42, %43 : vector<8x128xi32>
    %cst_15 = arith.constant 0.000000e+00 : f32
    %45 = vector.broadcast %cst_15 : f32 to vector<8x128xf32>
    %46 = arith.select %44, %38, %45 : vector<8x128xi1>, vector<8x128xf32>
    %cst_16 = arith.constant dense<0.000000e+00> : vector<128xf32>
    %47 = vector.multi_reduction <add>, %46, %cst_16 [0] : vector<8x128xf32> to vector<128xf32>
    %48 = vector.shape_cast %47 : vector<128xf32> to vector<1x128xf32>
    %c0_17 = arith.constant 0 : index
    %c0_18 = arith.constant 0 : index
    %49 = vector.load %arg2[%c0_17, %c0_18] : memref<1x128xf32, #tpu.memory_space<vmem>>, vector<1x128xf32>
    tpu.vector_store %arg2[%c0_17, %c0_18], %48 {strides = array<i32>} : memref<1x128xf32, #tpu.memory_space<vmem>>, vector<1x128xf32>,
    return
  }
  func.func @transform_0(%arg0: i32) -> (i32, i32, i32) {
    %c0_i32 = arith.constant 0 : i32
    %c0_i32_0 = arith.constant 0 : i32
    %c0_i32_1 = arith.constant 0 : i32
    return %c0_i32, %arg0, %c0_i32_0 : i32, i32, i32
  }
  func.func @transform_1(%arg0: i32) -> (i32, i32) {
    %c0_i32 = arith.constant 0 : i32
    %c0_i32_0 = arith.constant 0 : i32
    return %arg0, %c0_i32 : i32, i32
  }
}

</mosaic_0001>

<bundles_post_ra>
// kernel: tpu_custom_call.1
= control target key start
LH: loop header
LB: loop body
LE: loop exit
PB: predicated region body
PF: predicated region fallthrough
CT: control target
= control target key end

     0   :  { %6 = vsyncpa [#allocation3], 0  ;;  %s151_s0 = inlined_call_operand.hbm [shape: f32[4,8,128], index: 0, kind: input, shape index: {}]   ;;  %s152_s1 = inlined_call_operand.hbm [shape: f32[1,128], index: 1, kind: output, shape index: {}]  }
   0x1   :  { %7 = vsyncpa [#allocation4], 0  ;;  %s131_s6 = smov [#allocation2]  }
   0x2   :  { %s13_s7 = sshll.u32 %s131_s6, 4  ;;  %s14_s7 = int_to_ptr.vmem [resolvable:$true] %s13_s7 }
   0x3   :  { %s95_s8 = scalar_lea.vmem %s14_s7, 512  ;;  %p100_p1 = scmp.lt.s32.totalorder %s14_s7, %s14_s7 }
   0x4   :  { %p96_p0 = scmp.ne.s32.totalorder %s14_s7, %s95_s8  ;;  %p101_p2 = scmp.lt.s32.totalorder %s95_s8, %s95_s8 }
   0x6   :  { %p102_p3 = por %p101_p2, %p100_p1 }
   0x8   :  { %p103_p4 = pnand %p102_p3, %p96_p0 }
   0xa   :  { %106 = shalt.err (!%p103_p4)
}
   0xb   :  { %s132_s9 = smov 128   ;;  %s133_s10 = smov 8  }
   0xc   :  { %19 = dma.hbm_to_vmem [thread:$0]  %s151_s0, 512, %s14_s7, [#allocation3], %s132_s9, %s132_s9, %s133_s10  }
   0xd   :  { %127 = dma.done.wait [#allocation3], 512  }
   0xe   :  { %128 = vsyncadd [#allocation3], 4294966784  ;;  %v23_v0 = vld [vmem:[#allocation2] sm:$0xff]  ;;  %v25_v1 = vld [vmem:[#allocation2 + $0x8] sm:$0xff]  ;;  %s134_s0 = smov [#allocation5]  }
   0xf   :  { %v27_v2 = vld [vmem:[#allocation2 + $0x10] sm:$0xff]  ;;  %v29_v3 = vld [vmem:[#allocation2 + $0x18] sm:$0xff]  ;;  %v30_v4 = vsub.f32 %v23_v0, %v25_v1  ;;  %s74_s13 = sshll.u32 %s134_s0, 4  ;;  %s75_s13 = int_to_ptr.vmem [resolvable:$true] %s74_s13 }
  0x10   :  { %v34_v5 = vsub.f32 %v23_v0, %v27_v2  ;;  %v42_v6 = vsub.f32 %v25_v1, %v27_v2  ;;  %v38_v7 = vsub.f32 %v23_v0, %v29_v3  ;;  %v46_v8 = vsub.f32 %v25_v1, %v29_v3  ;;  %s107_s14 = scalar_lea.vmem %s75_s13, 16  ;;  %s111_s15 = scalar_lea.vmem %s75_s13, 32 }
  0x11   :  { %v31_v9 = vadd.f32 1e-06, %v30_v4  ;;  %v50_v12 = vsub.f32 %v27_v2, %v29_v3  ;;  %p108_p5 = scmp.ne.s32.totalorder %s75_s13, %s107_s14  ;;  %p112_p6 = scmp.lt.s32.totalorder %s75_s13, %s75_s13 }
  0x12   :  { %v35_v10 = vadd.f32 1e-06, %v34_v5  ;;  %v43_v11 = vadd.f32 1e-06, %v42_v6  ;;  %v39_v13 = vadd.f32 1e-06, %v38_v7  ;;  %p113_p7 = scmp.lt.s32.totalorder %s111_s15, %s107_s14 }
  0x13   :  { %v32_v14 = vmul.f32 %v31_v9, %v31_v9  ;;  %v47_v16 = vadd.f32 1e-06, %v46_v8  ;;  %v51_v20 = vadd.f32 1e-06, %v50_v12 }
  0x14   :  { %v36_v15 = vmul.f32 %v35_v10, %v35_v10  ;;  %v40_v17 = vmul.f32 %v39_v13, %v39_v13  ;;  %v44_v19 = vmul.f32 %v43_v11, %v43_v11  ;;  %p114_p8 = por %p113_p7, %p112_p6 }
  0x15   :  { %v48_v22 = vmul.f32 %v47_v16, %v47_v16  ;;  %v52_v24 = vmul.f32 %v51_v20, %v51_v20 }
  0x16   :  { %v37_v18 = vadd.f32 %v36_v15, %v32_v14  ;;  %p115_p9 = pnand %p114_p8, %p108_p5 }
  0x18   :  { %v41_v21 = vadd.f32 %v40_v17, %v37_v18 }
  0x1a   :  { %v45_v23 = vadd.f32 %v44_v19, %v41_v21 }
  0x1c   :  { %v49_v25 = vadd.f32 %v48_v22, %v45_v23 }
  0x1e   :  { %v53_v26 = vadd.f32 %v52_v24, %v49_v25 }
  0x20   :  { %v61_v27 = vrot.slane %v53_v26, 4 }
  0x22   :  { %v62_v28 = vadd.f32 %v61_v27, %v53_v26 }
  0x24   :  { %v63_v29 = vrot.slane %v62_v28, 2 }
  0x26   :  { %v64_v30 = vadd.f32 %v63_v29, %v62_v28 }
  0x28   :  { %v65_v31 = vrot.slane %v64_v30, 1 }
  0x2a   :  { %v66_v32 = vadd.f32 %v65_v31, %v64_v30 }
  0x2c   :  { %67 = vst [vmem:[#allocation5] sm:$0x1] %v66_v32 }
  0x2d   :  { %118 = shalt.err (!%p115_p9)
}
  0x2e   :  { %77 = dma.vmem_to_hbm [thread:$0]  %s75_s13, 16, %s152_s1, [#allocation4]  }
  0x2f   :  { %129 = dma.done.wait [#allocation4], 16  }
  0x30   :  { %130 = vsyncadd [#allocation4], 4294967280 }
  0x31   :  { %81 = vsyncpa [#allocation3], 1 }
  0x32   :  { %82 = vsyncpa [#allocation4], 1 }

</bundles_post_ra>
